<compile_context>
chip_gen: v5e
topology: v5e:2x2
jax: 0.10.0
libtpu: 0.0.40
codegen_flags: <defaults>
</compile_context>

<pallas_src>
import functools

import jax
import jax.numpy as jnp
from jax.experimental import pallas as pl
from jax.experimental.pallas import tpu as pltpu


def _round_up(x, m):
    return ((x + m - 1) // m) * m


def _tpu_generation():
    """Best-effort TPU generation (5/6/7); 0 if unknown. Only sets defaults."""
    try:
        kind = jax.devices()[0].device_kind.lower()
    except Exception:
        return 0
    for g in (7, 6, 5):
        if str(g) in kind:
            return g
    return 0


def _focal_loss_kernel(x_ref, t_ref, wa_ref, out_ref, *,
                       gamma, use_alpha, n_valid, tiles_per_split):
    s = pl.program_id(0)   # batch split (megacore-parallel on v7x)
    i = pl.program_id(1)   # sequential tile within the split (reduction axis)

    x = x_ref[...].astype(jnp.float32)   # (T, C) logits (bf16 upcast in-reg)
    t = t_ref[...]                       # (T, 1) int32 targets
    wa = wa_ref[...]                     # (C, 2): col 0 = weight, col 1 = alpha

    tn, c = x.shape

    # boolean target mask built with a 2-D iota (TPU needs >= 2-D iota);
    # reused for target-logit extraction and (as f32) for the MXU gather.
    class_ids = jax.lax.broadcasted_iota(jnp.int32, (tn, c), 1)
    mask = class_ids == t                                        # (T, C) bool

    # numerically stable log-softmax at the target class; (x - m) is computed
    # once and reused, so the target logit costs one select + one reduce.
    m = jnp.max(x, axis=1, keepdims=True)                        # (T, 1)
    xm = x - m                                                   # (T, C)
    # TODO(synk): on v7x, exp(xm) could run in bf16 (args <= 0) to relieve EUP.
    lse = jnp.log(jnp.sum(jnp.exp(xm), axis=1, keepdims=True))   # (T, 1)
    xt_m = jnp.sum(jnp.where(mask, xm, 0.0), axis=1, keepdims=True)
    logp_t = xt_m - lse                                          # (T, 1)

    # gather weight[target] / alpha[target] on the otherwise-idle MXU:
    # (T,C) one-hot @ (C,2) -> (T,2). HIGHEST precision keeps the f32 table
    # exact instead of a single bf16 pass.
    onehot = mask.astype(jnp.float32)
    wa_t = jnp.dot(onehot, wa, preferred_element_type=jnp.float32,
                   precision=jax.lax.Precision.HIGHEST)
    w_t = wa_t[:, 0:1]
    a_t = wa_t[:, 1:2]

    # F.cross_entropy(..., weight, reduction='none') semantics:
    #   ce_i = weight[target_i] * (-log_softmax(x_i)[target_i])
    ce = -w_t * logp_t                                           # (T, 1)

    # NOTE: pt = exp(-ce) = p_target ** weight[target] whenever weights != 1.
    # This intentionally mirrors the PyTorch module's torch.exp(-ce) quirk.
    pt = jnp.exp(-ce)
    q = 1.0 - pt

    # gamma is a Python float at trace time: specialize small integer gamma to
    # a VPU multiply chain (avoids pow -> log+exp on the single-issue EUP and
    # the log(0) edge case when pt -> 1).
    if float(gamma) == int(gamma) and 0 <= int(gamma) <= 8:
        mod = jnp.ones_like(q)
        for _ in range(int(gamma)):
            mod = mod * q
    else:
        mod = jnp.power(q, jnp.float32(gamma))

    focal = mod * ce
    if use_alpha:
        focal = a_t * focal

    # zero out rows beyond the real batch (last block may be partial; its tail
    # rows hold unspecified data and this select also blocks NaN propagation).
    row0 = (s * tiles_per_split + i) * tn
    local = jax.lax.broadcasted_iota(jnp.int32, (tn, 1), 0)
    focal = jnp.where(row0 + local < n_valid, focal, 0.0)

    # resident per-split f32 accumulator living in the output block
    @pl.when(i == 0)
    def _():
        out_ref[...] = jnp.zeros_like(out_ref)

    out_ref[...] += jnp.sum(focal)


def focal_loss_pallas(inputs, targets, loss_weight, alpha=None, gamma=2.0,
                      reduction="mean", tile_n=None, num_splits=None):
    # TODO(synk): reduction='none' needs a per-sample (N,) output spec.
    assert reduction in ("mean", "sum")
    n, c = inputs.shape
    use_alpha = alpha is not None
    if alpha is None:
        alpha = jnp.ones((c,), dtype=jnp.float32)

    gen = _tpu_generation()

    # keep bf16 logits as bf16 on the HBM->VMEM path; kernel upcasts in-reg
    x = inputs if inputs.dtype in (jnp.float32, jnp.bfloat16) \
        else inputs.astype(jnp.float32)
    t = targets.astype(jnp.int32).reshape(n, 1)
    w = loss_weight.astype(jnp.float32).reshape(c)
    a = alpha.astype(jnp.float32).reshape(c)
    wa = jnp.stack([w, a], axis=1)                    # (C, 2) weight/alpha table

    # Alignment-only pad (<= 7 rows, and only when N % 8 != 0). The full
    # tile*splits pad that copied the whole logits array in HBM is gone.
    n_aligned = _round_up(n, 8)
    if n_aligned != n:
        x = jnp.pad(x, ((0, n_aligned - n), (0, 0)))
        t = jnp.pad(t, ((0, n_aligned - n), (0, 0)))

    # --- tile sizing from a per-generation VMEM budget ----------------------
    # Per-row working set: double-buffered logits block + targets block plus
    # ~4 full-width f32/i32 temporaries inside the kernel (x.astype(f32),
    # x-m, exp(x-m), iota/mask/one-hot share buffers).
    if tile_n is None:
        budget = (48 << 20) if gen in (5, 6) else (16 << 20)  # v7x VMEM = 64 MiB
        bytes_per_row = 2 * c * x.dtype.itemsize + 2 * 4 + 4 * c * 4
        tile_n = max(8, budget // bytes_per_row)
    tile = max(8, min(int(tile_n), 4096, n_aligned))
    tile = (tile // 8) * 8
    total_tiles = pl.cdiv(n_aligned, tile)
    # TODO(synk): for vocab-scale C, add a class grid axis with an online
    # logsumexp so the block is tile x TILE_C instead of tile x C.

    # --- megacore split: only v7x has 2 TensorCores -------------------------
    splits = num_splits if num_splits is not None else (2 if gen >= 7 else 1)
    if splits > 1:
        if total_tiles < splits:
            splits = 1
        elif total_tiles % splits != 0:
            # nudge the tile down so the tile count divides evenly (keeps every
            # grid block inside the array; no fully-OOB blocks).
            want = _round_up(total_tiles, splits)
            new_tile = _round_up(pl.cdiv(n_aligned, want), 8)
            if pl.cdiv(n_aligned, new_tile) % splits == 0:
                tile = new_tile
                total_tiles = pl.cdiv(n_aligned, tile)
            else:
                splits = 1
    tiles_per_split = total_tiles // splits

    vmem_limit = (64 << 20) if gen in (5, 6) else (32 << 20)

    kernel = functools.partial(
        _focal_loss_kernel, gamma=float(gamma), use_alpha=use_alpha,
        n_valid=n, tiles_per_split=tiles_per_split)

    out = pl.pallas_call(
        kernel,
        out_shape=jax.ShapeDtypeStruct((splits * 8, 128), jnp.float32),
        grid=(splits, tiles_per_split),
        in_specs=[
            pl.BlockSpec((tile, c),
                         lambda s, i, tps=tiles_per_split: (s * tps + i, 0)),
            pl.BlockSpec((tile, 1),
                         lambda s, i, tps=tiles_per_split: (s * tps + i, 0)),
            pl.BlockSpec((c, 2), lambda s, i: (0, 0)),
        ],
        out_specs=pl.BlockSpec((8, 128), lambda s, i: (s, 0)),
        compiler_params=pltpu.CompilerParams(
            dimension_semantics=("parallel", "arbitrary"),
            vmem_limit_bytes=int(vmem_limit)),
    )(x, t, wa)

    total = jnp.sum(out[::8, 0])     # one partial sum per split
    if reduction == "mean":
        return total / jnp.float32(n)
    return total


def focal_loss_ref(inputs, targets, loss_weight, alpha=None, gamma=2.0):
    # pure-JAX reference mirroring the PyTorch module
    logp = jax.nn.log_softmax(inputs.astype(jnp.float32), axis=-1)
    logp_t = jnp.take_along_axis(logp, targets[:, None], axis=-1)[:, 0]
    ce = -loss_weight[targets] * logp_t
    pt = jnp.exp(-ce)
    focal = (1.0 - pt) ** gamma * ce
    if alpha is not None:
        focal = alpha[targets] * focal
    return jnp.mean(focal)


if __name__ == "__main__":
    key = jax.random.PRNGKey(0)
    k1, k2, k3, k4 = jax.random.split(key, 4)

    N, C = 10, 16  # N not a multiple of 8 -> exercises partial-block/mask path
    inputs = jax.random.normal(k1, (N, C), dtype=jnp.float32)
    targets = jax.random.randint(k2, (N,), 0, C, dtype=jnp.int32)
    loss_weight = jax.random.uniform(k3, (C,), dtype=jnp.float32,
                                     minval=0.5, maxval=1.5)
    alpha = jax.random.uniform(k4, (C,), dtype=jnp.float32,
                               minval=0.25, maxval=1.0)

    out = focal_loss_pallas(inputs, targets, loss_weight, alpha=alpha, gamma=2.0)
    out = jax.block_until_ready(out)

    ref = focal_loss_ref(inputs, targets, loss_weight, alpha=alpha, gamma=2.0)
    assert jnp.allclose(out, ref, rtol=1e-5, atol=1e-6), (out, ref)

    print("KERNEL_OK")
</pallas_src>

<mosaic_0001>
module attributes {stable_mosaic.version = 11 : i64} {
  func.func @_focal_loss_kernel(%arg0: i32, %arg1: i32, %arg2: memref<16x16xf32, #tpu.memory_space<vmem>>, %arg3: memref<16x1xi32, #tpu.memory_space<vmem>>, %arg4: memref<16x2xf32, #tpu.memory_space<vmem>>, %arg5: memref<8x128xf32, #tpu.memory_space<vmem>>) attributes {dimension_semantics = [#tpu.dimension_semantics<parallel>, #tpu.dimension_semantics<arbitrary>], iteration_bounds = array<i64: 1, 1>, scalar_prefetch = 0 : i64, scratch_operands = 0 : i64, tpu.core_type = #tpu.core_type<tc>, window_params = [{transform_indices = @transform_0, window_bounds = array<i64: 16, 16>}, {transform_indices = @transform_1, window_bounds = array<i64: 16, 1>}, {pipeline_mode = #tpu.pipeline_mode<synchronous>, transform_indices = @transform_2, window_bounds = array<i64: 16, 2>}, {transform_indices = @transform_3, window_bounds = array<i64: 8, 128>}]} {
    %c0 = arith.constant 0 : index
    %c0_0 = arith.constant 0 : index
    %0 = vector.load %arg2[%c0, %c0_0] : memref<16x16xf32, #tpu.memory_space<vmem>>, vector<16x16xf32>
    %c0_1 = arith.constant 0 : index
    %c0_2 = arith.constant 0 : index
    %1 = vector.load %arg3[%c0_1, %c0_2] : memref<16x1xi32, #tpu.memory_space<vmem>>, vector<16x1xi32>
    %c0_3 = arith.constant 0 : index
    %c0_4 = arith.constant 0 : index
    %2 = vector.load %arg4[%c0_3, %c0_4] : memref<16x2xf32, #tpu.memory_space<vmem>>, vector<16x2xf32>
    %3 = tpu.iota {dimensions = array<i32: 1>} : vector<16x16xi32>
    %4 = vector.broadcast %1 : vector<16x1xi32> to vector<16x16xi32>
    %5 = arith.cmpi eq, %3, %4 : vector<16x16xi32>
    %cst = arith.constant dense<0xFF800000> : vector<16xf32>
    %6 = vector.multi_reduction <maximumf>, %0, %cst [1] : vector<16x16xf32> to vector<16xf32>
    %7 = vector.shape_cast %6 : vector<16xf32> to vector<16x1xf32>
    %8 = vector.broadcast %7 : vector<16x1xf32> to vector<16x16xf32>
    %9 = arith.subf %0, %8 : vector<16x16xf32>
    %10 = math.exp %9 : vector<16x16xf32>
    %cst_5 = arith.constant dense<0.000000e+00> : vector<16xf32>
    %11 = vector.multi_reduction <add>, %10, %cst_5 [1] : vector<16x16xf32> to vector<16xf32>
    %12 = vector.shape_cast %11 : vector<16xf32> to vector<16x1xf32>
    %13 = math.log %12 : vector<16x1xf32>
    %cst_6 = arith.constant 0.000000e+00 : f32
    %14 = vector.broadcast %cst_6 : f32 to vector<16x16xf32>
    %15 = arith.select %5, %9, %14 : vector<16x16xi1>, vector<16x16xf32>
    %cst_7 = arith.constant dense<0.000000e+00> : vector<16xf32>
    %16 = vector.multi_reduction <add>, %15, %cst_7 [1] : vector<16x16xf32> to vector<16xf32>
    %17 = vector.shape_cast %16 : vector<16xf32> to vector<16x1xf32>
    %18 = arith.subf %17, %13 : vector<16x1xf32>
    %19 = arith.extui %5 : vector<16x16xi1> to vector<16x16xi32>
    %20 = arith.sitofp %19 : vector<16x16xi32> to vector<16x16xf32>
    %cst_8 = arith.constant dense<0.000000e+00> : vector<16x2xf32>
    %21 = tpu.matmul %20, %2, %cst_8 {dimension_numbers = #tpu.dot_dimension_numbers<[1], [0], [0], [1], [0, 0, 1, 1], [], []>, precision = #tpu.contract_precision<fp32>} : vector<16x16xf32>, vector<16x2xf32>, vector<16x2xf32> -> vector<16x2xf32>
    %22 = vector.extract_strided_slice %21 {offsets = [0, 0], sizes = [16, 1], strides = [1, 1]} : vector<16x2xf32> to vector<16x1xf32>
    %23 = vector.extract_strided_slice %21 {offsets = [0, 1], sizes = [16, 1], strides = [1, 1]} : vector<16x2xf32> to vector<16x1xf32>
    %cst_9 = arith.constant 0.000000e+00 : f32
    %24 = vector.broadcast %cst_9 : f32 to vector<16x1xf32>
    %25 = arith.subf %24, %22 : vector<16x1xf32>
    %26 = arith.mulf %25, %18 : vector<16x1xf32>
    %cst_10 = arith.constant 0.000000e+00 : f32
    %27 = vector.broadcast %cst_10 : f32 to vector<16x1xf32>
    %28 = arith.subf %27, %26 : vector<16x1xf32>
    %29 = math.exp %28 : vector<16x1xf32>
    %cst_11 = arith.constant 1.000000e+00 : f32
    %30 = vector.broadcast %cst_11 : f32 to vector<16x1xf32>
    %31 = arith.subf %30, %29 : vector<16x1xf32>
    %cst_12 = arith.constant 1.000000e+00 : f32
    %32 = vector.broadcast %cst_12 : f32 to vector<16x1xf32>
    %33 = arith.mulf %32, %31 : vector<16x1xf32>
    %34 = arith.mulf %33, %31 : vector<16x1xf32>
    %35 = arith.mulf %34, %26 : vector<16x1xf32>
    %36 = arith.mulf %23, %35 : vector<16x1xf32>
    %c1_i32 = arith.constant 1 : i32
    %37 = arith.muli %arg0, %c1_i32 : i32
    %38 = arith.addi %37, %arg1 : i32
    %c16_i32 = arith.constant 16 : i32
    %39 = arith.muli %38, %c16_i32 : i32
    %40 = tpu.iota {dimensions = array<i32: 0>} : vector<16x1xi32>
    %41 = vector.broadcast %39 : i32 to vector<16x1xi32>
    %42 = arith.addi %41, %40 : vector<16x1xi32>
    %c10_i32 = arith.constant 10 : i32
    %43 = vector.broadcast %c10_i32 : i32 to vector<16x1xi32>
    %44 = arith.cmpi slt, %42, %43 : vector<16x1xi32>
    %cst_13 = arith.constant 0.000000e+00 : f32
    %45 = vector.broadcast %cst_13 : f32 to vector<16x1xf32>
    %46 = arith.select %44, %36, %45 : vector<16x1xi1>, vector<16x1xf32>
    %c0_i32 = arith.constant 0 : i32
    %47 = arith.cmpi eq, %arg1, %c0_i32 : i32
    %48 = arith.extui %47 : i1 to i32
    %c0_i32_14 = arith.constant 0 : i32
    %49 = arith.cmpi ne, %48, %c0_i32_14 : i32
    scf.if %49 {
      %cst_20 = arith.constant 0.000000e+00 : f32
      %58 = vector.broadcast %cst_20 : f32 to vector<8x128xf32>
      %c0_21 = arith.constant 0 : index
      %c0_22 = arith.constant 0 : index
      %59 = vector.load %arg5[%c0_21, %c0_22] : memref<8x128xf32, #tpu.memory_space<vmem>>, vector<8x128xf32>
      tpu.vector_store %arg5[%c0_21, %c0_22], %58 {strides = array<i32>} : memref<8x128xf32, #tpu.memory_space<vmem>>, vector<8x128xf32>,
    } else {
    }
    %c0_15 = arith.constant 0 : index
    %c0_16 = arith.constant 0 : index
    %50 = vector.load %arg5[%c0_15, %c0_16] : memref<8x128xf32, #tpu.memory_space<vmem>>, vector<8x128xf32>
    %51 = vector.shape_cast %46 : vector<16x1xf32> to vector<1x16x1xf32>
    %cst_17 = arith.constant dense<0.000000e+00> : vector<1xf32>
    %52 = vector.multi_reduction <add>, %51, %cst_17 [1, 2] : vector<1x16x1xf32> to vector<1xf32>
    %53 = vector.shape_cast %52 : vector<1xf32> to vector<1x1x1xf32>
    %54 = vector.extract %53[0, 0, 0] : f32 from vector<1x1x1xf32>
    %55 = vector.broadcast %54 : f32 to vector<8x128xf32>
    %56 = arith.addf %50, %55 : vector<8x128xf32>
    %c0_18 = arith.constant 0 : index
    %c0_19 = arith.constant 0 : index
    %57 = vector.load %arg5[%c0_18, %c0_19] : memref<8x128xf32, #tpu.memory_space<vmem>>, vector<8x128xf32>
    tpu.vector_store %arg5[%c0_18, %c0_19], %56 {strides = array<i32>} : memref<8x128xf32, #tpu.memory_space<vmem>>, vector<8x128xf32>,
    return
  }
  func.func @transform_0(%arg0: i32, %arg1: i32) -> (i32, i32) {
    %c1_i32 = arith.constant 1 : i32
    %0 = arith.muli %arg0, %c1_i32 : i32
    %1 = arith.addi %0, %arg1 : i32
    %c0_i32 = arith.constant 0 : i32
    %c0_i32_0 = arith.constant 0 : i32
    return %1, %c0_i32 : i32, i32
  }
  func.func @transform_1(%arg0: i32, %arg1: i32) -> (i32, i32) {
    %c1_i32 = arith.constant 1 : i32
    %0 = arith.muli %arg0, %c1_i32 : i32
    %1 = arith.addi %0, %arg1 : i32
    %c0_i32 = arith.constant 0 : i32
    %c0_i32_0 = arith.constant 0 : i32
    return %1, %c0_i32 : i32, i32
  }
  func.func @transform_2(%arg0: i32, %arg1: i32) -> (i32, i32) {
    %c0_i32 = arith.constant 0 : i32
    %c0_i32_0 = arith.constant 0 : i32
    %c0_i32_1 = arith.constant 0 : i32
    return %c0_i32, %c0_i32_0 : i32, i32
  }
  func.func @transform_3(%arg0: i32, %arg1: i32) -> (i32, i32) {
    %c0_i32 = arith.constant 0 : i32
    %c0_i32_0 = arith.constant 0 : i32
    return %arg0, %c0_i32 : i32, i32
  }
}

</mosaic_0001>

<bundles_post_ra>
// kernel: tpu_custom_call.1
= control target key start
LH: loop header
LB: loop body
LE: loop exit
PB: predicated region body
PF: predicated region fallthrough
CT: control target
= control target key end

     0   :  { %vm75_vm0 = vcmask 130048   ;;  %v462_v2 = vmov 0   ;;  %s524_s0 = inlined_call_operand.vmem [shape: f32[16,16], index: 0, kind: input, shape index: {}]   ;;  %s525_s1 = inlined_call_operand.vmem [shape: s32[16,1], index: 1, kind: input, shape index: {}]   ;;  %s526_s2 = inlined_call_operand.vmem [shape: f32[16,2], index: 2, kind: input, shape index: {}]   ;;  %s527_s3 = inlined_call_operand.hbm [shape: f32[8,128], index: 3, kind: output, shape index: {}]  }
   0x1   :  { %v62_v0 = vld [vmem:[%s525_s1 + $0x8] sm:$0xff]  ;;  %423 = vset.pattern.permute.xlu0 %v462_v2 }
   0x2   :  { %v60_v1 = vld [vmem:[%s524_s0 + $0x8] sm:$0xff] }
   0x3   :  { %v79_v3 = vsel %vm75_vm0, %v60_v1, -inf  ;;  %v64_v4 = vld [vmem:[%s526_s2 + $0x8] sm:$0xff] }
   0x4   :  { %8 = vsyncpa [#allocation3], 0  ;;  %71 = vperm.xlu0 %423, %v62_v0   ;;  %80 = vmax.xlane.f32.xlu1 %v79_v3  ;;  %v132_v5 = vand.u32 4294901760, %v64_v4  ;;  %v59_v6 = vld [vmem:[%s524_s0] sm:$0xff]  ;;  %v65_v19 = vlaneseq  ;;  %v463_v23 = vmov 0.0   ;;  %s464_s0 = smov 1  }
   0x5   :  { %v61_v9 = vld [vmem:[%s525_s1] sm:$0xff]  ;;  %v76_v10 = vsel %vm75_vm0, %v59_v6, -inf  ;;  %s465_s1 = smov 127   ;;  %vm360_vm4 = vcmask 7168   ;;  %s383_s27 = sshll.u32 %s527_s3, 4  ;;  %s384_s27 = int_to_ptr.hbm [resolvable:$true] %s383_s27 }
   0x6   :  { %v168_v7 = vsub.f32 %v64_v4, %v132_v5  ;;  %412 = vmatpush.msra.mxu2 %v132_v5  ;;  %133 = vmatpush.msra.mxu0 %v132_v5  ;;  %v63_v13 = vld [vmem:[%s526_s2] sm:$0xff]  ;;  %v66_v20 = vand.u32 127, %v65_v19  ;;  %s466_s2 = smov [#allocation2]  }
   0x7   :  { %v134_v14 = vand.u32 4294901760, %v63_v13  ;;  %s381_s24 = sshll.u32 %s466_s2, 4  ;;  %s382_s24 = int_to_ptr.vmem [resolvable:$true] %s381_s24 }
   0x8   :  { %v169_v8 = vand.u32 4294901760, %v168_v7 }
   0x9   :  { %v174_v15 = vsub.f32 %v63_v13, %v134_v14  ;;  %413 = vmatpush.msra.mxu2 %v134_v14  ;;  %135 = vmatpush.msra.mxu0 %v134_v14 }
   0xa   :  { %v170_v11 = vsub.f32 %v168_v7, %v169_v8 }
   0xb   :  { %204 = vmatpush.msrb.mxu2 %v168_v7  ;;  %267 = vmatpush.msrb.mxu0 %v169_v8  ;;  %v175_v16 = vand.u32 4294901760, %v174_v15 }
   0xc   :  { %68 = vperm.xlu0 %423, %v61_v9   ;;  %77 = vmax.xlane.f32.xlu1 %v76_v10  ;;  %v171_v12 = vand.u32 4294901760, %v170_v11 }
   0xd   :  { %207 = vmatpush.msrb.mxu2 %v174_v15  ;;  %v176_v17 = vsub.f32 %v174_v15, %v175_v16  ;;  %271 = vmatpush.msrb.mxu0 %v175_v16 }
   0xe   :  { %414 = vmatpush.msra.mxu3 %v171_v12  ;;  %172 = vmatpush.msra.mxu1 %v171_v12 }
   0xf   :  { %v177_v18 = vand.u32 4294901760, %v176_v17 }
  0x11   :  { %415 = vmatpush.msra.mxu3 %v177_v18  ;;  %178 = vmatpush.msra.mxu1 %v177_v18 }
  0x13   :  { %234 = vmatpush.msrb.mxu3 %v132_v5  ;;  %296 = vmatpush.msrb.mxu1 %v132_v5 }
  0x15   :  { %236 = vmatpush.msrb.mxu3 %v134_v14  ;;  %298 = vmatpush.msrb.mxu1 %v134_v14 }
  0x76   :  { %v72_v21 = vpop.permute.xlu0 %71 }
  0x77   :  { %vm74_vm1 = vcmp.eq.s32.totalorder %v66_v20, %v72_v21  ;;  %v81_v22 = vpop.xlane.xlu1 %80 }
  0x78   :  { %v405_v24 = vsel %vm74_vm1, 1.0, %v463_v23  ;;  %v83_v25 = vsub.f32 %v60_v1, %v81_v22 }
  0x79   :  { %v116_v26 = vsel %vm75_vm0, %v405_v24, 0  ;;  %407 = vmatmul.msk.f32.vlgmr.msra.gmra.mxu3 %vm75_vm0, %v405_v24 }
  0x7a   :  { %v145_v27 = vsub.f32 %v116_v26, %v116_v26  ;;  %v86_v28 = vmul.f32 1.442695, %v83_v25  ;;  %v99_v29 = vsel %vm74_vm1, %v83_v25, 0.0 }
  0x7b   :  { %v103_v30 = vsel %vm75_vm0, %v99_v29, 0.0 }
  0x7c   :  { %424 = vpow2.f32 %v86_v28  ;;  %104 = vadd.xlane.f32.xlu0 %v103_v30  ;;  %v146_v31 = vand.u32 4294901760, %v145_v27 }
  0x7e   :  { %v69_v32 = vpop.permute.xlu0 %68  ;;  %v147_v33 = vsub.f32 %v145_v27, %v146_v31 }
  0x7f   :  { %vm73_vm2 = vcmp.eq.s32.totalorder %v66_v20, %v69_v32  ;;  %v78_v34 = vpop.xlane.xlu1 %77 }
  0x80   :  { %v404_v35 = vsel %vm73_vm2, 1.0, %v463_v23  ;;  %v82_v36 = vsub.f32 %v59_v6, %v78_v34  ;;  %v148_v37 = vand.u32 4294901760, %v147_v33 }
  0x81   :  { %v113_v38 = vsel %vm75_vm0, %v404_v35, 0  ;;  %406 = vmatmul.msk.f32.vlgmr.msra.gmra.mxu1 %vm75_vm0, %v404_v35 }
  0x82   :  { %v425_v39 = vpop.eup %424  ;;  %v137_v40 = vsub.f32 %v113_v38, %v113_v38  ;;  %v84_v41 = vmul.f32 1.442695, %v82_v36  ;;  %149 = vmatmul.f32.vlgmr.msra.gmra.mxu2 %v148_v37  ;;  %v98_v42 = vsel %vm73_vm2, %v82_v36, 0.0 }
  0x83   :  { %v91_v43 = vsel %vm75_vm0, %v425_v39, 0.0  ;;  %v100_v44 = vsel %vm75_vm0, %v98_v42, 0.0 }
  0x84   :  { %426 = vpow2.f32 %v84_v41  ;;  %92 = vadd.xlane.f32.xlu2 %v91_v43  ;;  %101 = vadd.xlane.f32.xlu1 %v100_v44  ;;  %v138_v45 = vand.u32 4294901760, %v137_v40 }
  0x86   :  { %240 = vmatmul.f32.vlgmr.msrb.gmra.mxu3 %v138_v45  ;;  %v139_v46 = vsub.f32 %v137_v40, %v138_v45 }
  0x88   :  { %v140_v47 = vand.u32 4294901760, %v139_v46 }
  0x89   :  { %410 = vmatmul.msk.f32.vlgmr.msrb.gmra.mxu1 %vm75_vm0, %v404_v35 }
  0x8a   :  { %v427_v48 = vpop.eup %426  ;;  %141 = vmatmul.f32.vlgmr.msra.gmra.mxu0 %v140_v47  ;;  %210 = vmatmul.f32.vlgmr.msrb.gmra.mxu2 %v137_v40 }
  0x8b   :  { %v88_v49 = vsel %vm75_vm0, %v427_v48, 0.0 }
  0x8c   :  { %89 = vadd.xlane.f32.xlu2 %v88_v49 }
  0x8e   :  { %246 = vmatmul.f32.gmra.mxu3 %v146_v31 }
  0x91   :  { %411 = vmatmul.msk.f32.gmra.mxu1 %vm75_vm0, %v405_v24 }
  0x92   :  { %215 = vmatmul.f32.gmra.mxu2 %v145_v27  ;;  %408 = vmatmul.msk.f32.vlgmr.msrb.gmra.mxu0 %vm75_vm0, %v404_v35  ;;  %v337_v35 = vshrl.u32 %v65_v19, 7 }
  0x94   :  { %v338_v39 = vadd.s32 8, %v337_v35 }
  0x96   :  { %vm343_vm3 = vcmp.lt.s32.totalorder %v338_v39, 10 }
  0x9a   :  { %409 = vmatmul.msk.f32.gmra.mxu0 %vm75_vm0, %v405_v24 }
  0xef   :  { %v105_v21 = vpop.xlane.xlu0 %104 }
  0xf7   :  { %v93_v50 = vpop.xlane.xlu2 %92  ;;  %v102_v4 = vpop.xlane.xlu1 %101 }
  0xfc   :  { %v185_v51 = vpop.f32.mrf.mxu3 }
  0xfe   :  { %v181_v54 = vpop.f32.mrf.mxu1 }
  0xff   :  { %v90_v53 = vpop.xlane.xlu2 %89 }
 0x100   :  { %428 = vlog2.f32 %v90_v53 }
 0x101   :  { %430 = vlog2.f32 %v93_v50 }
 0x105   :  { %v150_v52 = vpop.f32.mrf.mxu2 }
 0x106   :  { %v429_v60 = vpop.eup %428  ;;  %v301_v63 = vpop.f32.mrf.mxu1  ;;  %v186_v2 = vadd.f32 %v185_v51, %v150_v52 }
 0x107   :  { %v142_v55 = vpop.f32.mrf.mxu0  ;;  %v95_v0 = vmul.f32 0.6931472, %v429_v60  ;;  %v431_v9 = vpop.eup %430 }
 0x108   :  { %v182_v56 = vadd.f32 %v181_v54, %v142_v55  ;;  %v97_v14 = vmul.f32 0.6931472, %v431_v9 }
 0x109   :  { %v241_v57 = vpop.f32.mrf.mxu3  ;;  %v106_v6 = vsub.f32 %v102_v4, %v95_v0 }
 0x10a   :  { %v107_v22 = vsub.f32 %v105_v21, %v97_v14 }
 0x10d   :  { %v211_v58 = vpop.f32.mrf.mxu2 }
 0x10e   :  { %v212_v59 = vadd.f32 %v211_v58, %v182_v56  ;;  %v305_v17 = vpop.f32.mrf.mxu1 }
 0x10f   :  { %v274_v61 = vpop.f32.mrf.mxu0 }
 0x110   :  { %v242_v62 = vadd.f32 %v241_v57, %v212_v59 }
 0x111   :  { %v247_v10 = vpop.f32.mrf.mxu3 }
 0x112   :  { %v275_v1 = vadd.f32 %v274_v61, %v242_v62 }
 0x114   :  { %v302_v3 = vadd.f32 %v301_v63, %v275_v1 }
 0x115   :  { %v216_v5 = vpop.f32.mrf.mxu2 }
 0x116   :  { %v308_v7 = vsub.f32 0.0, %v302_v3  ;;  %v217_v8 = vadd.f32 %v216_v5, %v186_v2 }
 0x117   :  { %v278_v13 = vpop.f32.mrf.mxu0 }
 0x118   :  { %v248_v11 = vadd.f32 %v247_v10, %v217_v8  ;;  %v310_v12 = vmul.f32 %v308_v7, %v106_v6 }
 0x11a   :  { %v279_v15 = vadd.f32 %v278_v13, %v248_v11  ;;  %v312_v16 = vsub.f32 0.0, %v310_v12 }
 0x11c   :  { %v306_v18 = vadd.f32 %v305_v17, %v279_v15  ;;  %v314_v20 = vmul.f32 1.442695, %v312_v16 }
 0x11e   :  { %v309_v23 = vsub.f32 0.0, %v306_v18  ;;  %432 = vpow2.f32 %v314_v20 }
 0x120   :  { %v311_v24 = vmul.f32 %v309_v23, %v107_v22 }
 0x122   :  { %v313_v25 = vsub.f32 0.0, %v311_v24 }
 0x124   :  { %v433_v26 = vpop.eup %432  ;;  %v316_v27 = vmul.f32 1.442695, %v313_v25 }
 0x125   :  { %v318_v28 = vsub.f32 1.0, %v433_v26 }
 0x126   :  { %434 = vpow2.f32 %v316_v27 }
 0x127   :  { %v320_v29 = vmul.f32 %v318_v28, %v318_v28 }
 0x129   :  { %v322_v30 = vmul.f32 %v320_v29, %v310_v12 }
 0x12b   :  { %326 = vrot.lane.b32.xlu1 %v322_v30, %s464_s0 }
 0x12c   :  { %v435_v31 = vpop.eup %434 }
 0x12d   :  { %v319_v32 = vsub.f32 1.0, %v435_v31 }
 0x12f   :  { %v321_v33 = vmul.f32 %v319_v32, %v319_v32 }
 0x131   :  { %v323_v34 = vmul.f32 %v321_v33, %v311_v24 }
 0x133   :  { %328 = vrot.lane.b32.xlu2 %v323_v34, %s464_s0 }
 0x18d   :  { %v329_v38 = vpop.permute.xlu2 %328 }
 0x18e   :  { %v333_v40 = vmul.f32 %v329_v38, %v306_v18 }
 0x190   :  { %v345_v41 = vsel %vm343_vm3, %v333_v40, 0.0 }
 0x19d   :  { %v327_v36 = vpop.permute.xlu1 %326 }
 0x19e   :  { %v332_v37 = vmul.f32 %v327_v36, %v302_v3 }
 0x1a0   :  { %354 = vrot.lane.b32.xlu2 %v332_v37, %s465_s1 }
 0x1a8   :  { %356 = vrot.lane.b32.xlu2 %v345_v41, %s465_s1 }
 0x1fa   :  { %v355_v42 = vpop.permute.xlu2 %354 }
 0x1fb   :  { %v361_v44 = vsel %vm360_vm4, %v355_v42, 0.0 }
 0x202   :  { %v357_v43 = vpop.permute.xlu2 %356 }
 0x203   :  { %v362_v45 = vsel %vm360_vm4, %v357_v43, 0.0 }
 0x204   :  { %v363_v46 = vadd.f32 %v362_v45, %v361_v44 }
 0x206   :  { %364 = vadd.xlane.f32.xlu1 %v363_v46 }
 0x279   :  { %v365_v47 = vpop.xlane.xlu1 %364 }
 0x27a   :  { %v366_v48 = vrot.slane %v365_v47, 4 }
 0x27c   :  { %v367_v19 = vadd.f32 %v366_v48, %v365_v47 }
 0x27e   :  { %v368_v49 = vrot.slane %v367_v19, 2 }
 0x280   :  { %v369_v50 = vadd.f32 %v368_v49, %v367_v19 }
 0x282   :  { %v370_v51 = vrot.slane %v369_v50, 1 }
 0x284   :  { %v371_v52 = vadd.f32 %v370_v51, %v369_v50 }
 0x286   :  { %416 = vpush %v371_v52 }
 0x2b7   :  { %s417_s28 = spop %416 }
 0x2b8   :  { %v373_v53 = vstv %s417_s28 }
 0x2b9   :  { %375 = vst [vmem:[#allocation2] sm:$0xff] %v373_v53 }
 0x2ba   :  { %386 = dma.vmem_to_hbm [thread:$0]  %s382_s24, 128, %s384_s27, [#allocation3]  }
 0x2bb   :  { %460 = dma.done.wait [#allocation3], 128  }
 0x2bc   :  { %461 = vsyncadd [#allocation3], 4294967168 }
 0x2bd   :  { %391 = vsyncpa [#allocation3], 1 }

</bundles_post_ra>
